<compile_context>
chip_gen: v6e
topology: v6e:2x2x1
jax: 0.10.0
libtpu: 0.0.40
codegen_flags: <defaults>
</compile_context>

<pallas_src>
import functools

import jax
import jax.numpy as jnp
from jax.experimental import pallas as pl
from jax.experimental.pallas import tpu as pltpu


# ---------------------------------------------------------------------------
# Pallas kernels: tiled  acc += P @ W ; epilogue: *scale + bias [+res] -> ReLU
# ---------------------------------------------------------------------------
def _conv_bn_act_kernel(p_ref, w_ref, s_ref, b_ref, o_ref, acc_ref, *, relu):
    k = pl.program_id(2)

    @pl.when(k == 0)
    def _():
        acc_ref[...] = jnp.zeros_like(acc_ref)

    acc_ref[...] += jnp.dot(p_ref[...], w_ref[...],
                            preferred_element_type=jnp.float32)

    @pl.when(k == pl.num_programs(2) - 1)
    def _():
        y = acc_ref[...] * s_ref[...] + b_ref[...]
        if relu:
            y = jnp.maximum(y, 0.0)
        o_ref[...] = y.astype(o_ref.dtype)


def _conv_bn_add_relu_kernel(p_ref, w_ref, s_ref, b_ref, res_ref, o_ref,
                             acc_ref):
    k = pl.program_id(2)

    @pl.when(k == 0)
    def _():
        acc_ref[...] = jnp.zeros_like(acc_ref)

    acc_ref[...] += jnp.dot(p_ref[...], w_ref[...],
                            preferred_element_type=jnp.float32)

    @pl.when(k == pl.num_programs(2) - 1)
    def _():
        y = (acc_ref[...] * s_ref[...] + b_ref[...]
             + res_ref[...].astype(jnp.float32))
        o_ref[...] = jnp.maximum(y, 0.0).astype(o_ref.dtype)


def _conv_bn_proj_add_relu_kernel(p_ref, w_ref, s_ref, b_ref,
                                  xs_ref, ws_ref, bs_ref,
                                  o_ref, acc_ref):
    k = pl.program_id(2)

    @pl.when(k == 0)
    def _():
        acc_ref[...] = jnp.zeros_like(acc_ref)

    acc_ref[...] += jnp.dot(p_ref[...], w_ref[...],
                            preferred_element_type=jnp.float32)

    @pl.when(k == pl.num_programs(2) - 1)
    def _():
        # Fused 1x1-conv shortcut (BN scale pre-folded into ws), once per tile.
        res = jnp.dot(xs_ref[...], ws_ref[...],
                      preferred_element_type=jnp.float32) + bs_ref[...]
        y = acc_ref[...] * s_ref[...] + b_ref[...] + res
        o_ref[...] = jnp.maximum(y, 0.0).astype(o_ref.dtype)


# ---------------------------------------------------------------------------
# Tiled GEMM wrapper (padding, BlockSpecs, grid)
# ---------------------------------------------------------------------------
def _cdiv(a, b):
    return -(-a // b)


def _round_up(x, m):
    return _cdiv(x, m) * m


def _pad2(a, rows, cols):
    pr, pc = rows - a.shape[0], cols - a.shape[1]
    if pr == 0 and pc == 0:
        return a
    return jnp.pad(a, ((0, pr), (0, pc)))


def _pad1(a, n):
    p = n - a.shape[0]
    return a if p == 0 else jnp.pad(a, (0, p))


def _split_units(total_units, cap_units):
    """Split `total_units` (128-wide lanes/sublanes) into the minimal number of
    steps whose tile is <= cap_units; returns (tile_units, steps)."""
    steps = max(1, _cdiv(total_units, cap_units))
    tile_units = _cdiv(total_units, steps)
    return tile_units, steps


def fused_conv_gemm(patches, w_mat, scale, bias, *, relu=True,
                    residual=None, shortcut=None, out_dtype=jnp.float32):
    """out = act((patches @ w_mat) * scale + bias [+ residual | + 1x1 shortcut]).

    patches: (M, K); w_mat: (K, N); scale/bias: (N,)
    residual: optional (M, N) identity-shortcut tile, added in the epilogue.
    shortcut: optional (xs (M, Cs), ws (Cs, N) with BN scale folded, bs (N,))
              projection shortcut, fused into the epilogue.
    """
    M, K = patches.shape
    N = w_mat.shape[1]

    m_units = _cdiv(M, 128)
    n_units = _cdiv(N, 128)
    k_units = _cdiv(K, 128)

    # Tile caps (in 128-lanes): tm<=1024, tn<=512, tk<=2048.  tk always divides
    # the padded K so no extra K padding beyond round_up(K, 128).
    tn_u, n_steps = _split_units(n_units, 4)
    tk_u, k_steps = _split_units(k_units, 16)
    tm_u, m_steps = _split_units(m_units, 8)

    # Megacore (v7x): ensure >=2 parallel (i, j) blocks whenever M allows it.
    if m_steps * n_steps < 2 and m_units >= 2:
        tm_u = _cdiv(m_units, 2)
        m_steps = _cdiv(m_units, tm_u)

    tm, tn, tk = tm_u * 128, tn_u * 128, tk_u * 128
    m_pad, n_pad, k_pad = tm * m_steps, tn * n_steps, tk * k_steps

    p = _pad2(patches.astype(jnp.bfloat16), m_pad, k_pad)
    w = _pad2(w_mat.astype(jnp.bfloat16), k_pad, n_pad)
    s = _pad1(scale.astype(jnp.float32), n_pad).reshape(1, n_pad)
    b = _pad1(bias.astype(jnp.float32), n_pad).reshape(1, n_pad)

    grid = (m_steps, n_steps, k_steps)

    p_spec = pl.BlockSpec((tm, tk), lambda i, j, k: (i, k))
    w_spec = pl.BlockSpec((tk, tn), lambda i, j, k: (k, j))
    sb_spec = pl.BlockSpec((1, tn), lambda i, j, k: (0, j))
    o_spec = pl.BlockSpec((tm, tn), lambda i, j, k: (i, j))

    args = [p, w, s, b]
    in_specs = [p_spec, w_spec, sb_spec, sb_spec]

    out_isz = jnp.dtype(out_dtype).itemsize
    # Double-buffered tile working set (p, w, o) + accumulator + scale/bias.
    vmem_bytes = (2 * (tm * tk * 2 + tk * tn * 2 + tm * tn * out_isz)
                  + tm * tn * 4 + 4 * tn * 4)

    if shortcut is not None:
        xs, ws, bs = shortcut
        cs_pad = _round_up(xs.shape[1], 128)
        args += [
            _pad2(xs.astype(jnp.bfloat16), m_pad, cs_pad),
            _pad2(ws.astype(jnp.bfloat16), cs_pad, n_pad),
            _pad1(bs.astype(jnp.float32), n_pad).reshape(1, n_pad),
        ]
        in_specs += [
            pl.BlockSpec((tm, cs_pad), lambda i, j, k: (i, 0)),
            pl.BlockSpec((cs_pad, tn), lambda i, j, k: (0, j)),
            sb_spec,
        ]
        kern = _conv_bn_proj_add_relu_kernel
        flops = 2 * m_pad * n_pad * (k_pad + cs_pad)
        vmem_bytes += 2 * (tm * cs_pad * 2 + cs_pad * tn * 2 + tn * 4)
    elif residual is not None:
        args.append(_pad2(residual.astype(jnp.bfloat16), m_pad, n_pad))
        in_specs.append(pl.BlockSpec((tm, tn), lambda i, j, k: (i, j)))
        kern = _conv_bn_add_relu_kernel
        flops = 2 * m_pad * n_pad * k_pad
        vmem_bytes += 2 * tm * tn * 2
    else:
        kern = functools.partial(_conv_bn_act_kernel, relu=relu)
        flops = 2 * m_pad * n_pad * k_pad

    bytes_accessed = int(sum(a.size * a.dtype.itemsize for a in args)
                         + m_pad * n_pad * out_isz)
    vmem_limit = int(min(max(vmem_bytes * 3 // 2, 32 * 1024 * 1024),
                         48 * 1024 * 1024))

    out = pl.pallas_call(
        kern,
        out_shape=jax.ShapeDtypeStruct((m_pad, n_pad), out_dtype),
        grid_spec=pltpu.PrefetchScalarGridSpec(
            num_scalar_prefetch=0,
            grid=grid,
            in_specs=in_specs,
            out_specs=o_spec,
            scratch_shapes=[pltpu.VMEM((tm, tn), jnp.float32)]),
        compiler_params=pltpu.CompilerParams(
            dimension_semantics=("parallel", "parallel", "arbitrary"),
            vmem_limit_bytes=vmem_limit),
        cost_estimate=pl.CostEstimate(flops=flops, transcendentals=0,
                                      bytes_accessed=bytes_accessed),
    )(*args)

    if m_pad != M or n_pad != N:
        out = out[:M, :N]
    return out


# ---------------------------------------------------------------------------
# Glue: im2col, BN folding, parameter construction
# ---------------------------------------------------------------------------
def _im2col(x_pad, k, stride, Ho, Wo):
    """x_pad: (N, Hp, Wp, C) -> (N*Ho*Wo, k*k*C) with (kh, kw, c) ordering."""
    n, _, _, c = x_pad.shape
    cols = []
    for kh in range(k):
        for kw in range(k):
            cols.append(
                x_pad[:, kh:kh + stride * (Ho - 1) + 1:stride,
                         kw:kw + stride * (Wo - 1) + 1:stride, :])
    patches = jnp.stack(cols, axis=3)          # (N, Ho, Wo, k*k, C)
    return patches.reshape(n * Ho * Wo, k * k * c)


def _fold_bn(bn):
    scale = bn["gamma"] / jnp.sqrt(bn["var"] + bn["eps"])
    bias = bn["beta"] - bn["mean"] * scale
    return scale, bias


def _w_to_mat(w):  # (Cout, Cin, kh, kw) -> (kh*kw*Cin, Cout)
    cout = w.shape[0]
    return jnp.transpose(w, (2, 3, 1, 0)).reshape(-1, cout)


def make_params(key, in_planes, planes, stride):
    ks = jax.random.split(key, 12)

    def bn_params(k, c):
        k1, k2, k3, k4 = jax.random.split(k, 4)
        return dict(
            gamma=1.0 + 0.1 * jax.random.normal(k1, (c,), jnp.float32),
            beta=0.1 * jax.random.normal(k2, (c,), jnp.float32),
            mean=0.1 * jax.random.normal(k3, (c,), jnp.float32),
            var=1.0 + 0.1 * jax.random.uniform(k4, (c,), jnp.float32),
            eps=1e-5,
        )

    params = dict(
        w1=0.1 * jax.random.normal(ks[0], (planes, in_planes, 3, 3), jnp.float32),
        bn1=bn_params(ks[1], planes),
        w2=0.1 * jax.random.normal(ks[2], (planes, planes, 3, 3), jnp.float32),
        bn2=bn_params(ks[3], planes),
    )
    if stride != 1 or in_planes != planes:
        params["ws"] = 0.1 * jax.random.normal(
            ks[4], (planes, in_planes, 1, 1), jnp.float32)
        params["bns"] = bn_params(ks[5], planes)
    return params


# ---------------------------------------------------------------------------
# BasicBlock forward (Pallas)
# ---------------------------------------------------------------------------
def basic_block_forward(x_nchw, params, stride):
    x = jnp.transpose(x_nchw, (0, 2, 3, 1)).astype(jnp.bfloat16)  # NCHW->NHWC
    n, h, w, cin = x.shape
    planes = params["w1"].shape[0]
    ho = (h + 2 - 3) // stride + 1
    wo = (w + 2 - 3) // stride + 1
    m = n * ho * wo

    # conv1 (3x3, stride, pad 1) + bn1 + ReLU  ->  bf16 NHWC intermediate
    x_pad = jnp.pad(x, ((0, 0), (1, 1), (1, 1), (0, 0)))
    p1 = _im2col(x_pad, 3, stride, ho, wo)
    s1, b1 = _fold_bn(params["bn1"])
    out1 = fused_conv_gemm(p1, _w_to_mat(params["w1"]), s1, b1,
                           relu=True, out_dtype=jnp.bfloat16)

    # conv2 (3x3, stride 1, pad 1) + bn2 + shortcut + ReLU (single kernel)
    out1_img = out1.reshape(n, ho, wo, planes)
    out1_pad = jnp.pad(out1_img, ((0, 0), (1, 1), (1, 1), (0, 0)))
    p2 = _im2col(out1_pad, 3, 1, ho, wo)
    s2, b2 = _fold_bn(params["bn2"])
    w2 = _w_to_mat(params["w2"])

    if stride != 1 or cin != planes:
        # 1x1 projection shortcut, fused into the conv2 kernel epilogue.
        # BN scale folded into the projection weights.
        xs = x[:, ::stride, ::stride, :].reshape(m, cin)
        ss, bs = _fold_bn(params["bns"])
        ws_mat = _w_to_mat(params["ws"]) * ss[None, :]
        out = fused_conv_gemm(p2, w2, s2, b2,
                              shortcut=(xs, ws_mat, bs),
                              out_dtype=jnp.float32)
    else:
        # Identity shortcut tile added in the epilogue.
        out = fused_conv_gemm(p2, w2, s2, b2, residual=x.reshape(m, cin),
                              out_dtype=jnp.float32)

    out = out.reshape(n, ho, wo, planes)
    return jnp.transpose(out, (0, 3, 1, 2)).astype(jnp.float32)  # NHWC->NCHW


# ---------------------------------------------------------------------------
# Pure-JAX reference (lax.conv) for correctness check.  Operands are rounded
# to bf16 where the Pallas path rounds them, so only accumulation order (and
# the shortcut BN-scale fold) differs.
# ---------------------------------------------------------------------------
def reference_forward(x_nchw, params, stride):
    bf = lambda a: a.astype(jnp.bfloat16).astype(jnp.float32)
    x = bf(jnp.transpose(x_nchw, (0, 2, 3, 1)))

    def conv(inp, wt, s, pad):
        w_hwio = bf(jnp.transpose(wt, (2, 3, 1, 0)))
        return jax.lax.conv_general_dilated(
            bf(inp), w_hwio, window_strides=(s, s),
            padding=[(pad, pad), (pad, pad)],
            dimension_numbers=("NHWC", "HWIO", "NHWC"),
            preferred_element_type=jnp.float32)

    def bn(inp, p):
        sc, bi = _fold_bn(p)
        return inp * sc + bi

    out = jax.nn.relu(bn(conv(x, params["w1"], stride, 1), params["bn1"]))
    out = bf(out)                      # Pallas path stores conv1 output in bf16
    out = bn(conv(out, params["w2"], 1, 1), params["bn2"])
    cin, planes = x.shape[-1], params["w1"].shape[0]
    if stride != 1 or cin != planes:
        sc = bn(conv(x, params["ws"], stride, 0), params["bns"])
    else:
        sc = x
    out = jax.nn.relu(out + sc)
    return jnp.transpose(out, (0, 3, 1, 2))


if __name__ == "__main__":
    key = jax.random.PRNGKey(0)
    fwd = jax.jit(basic_block_forward, static_argnums=2)

    # Case 1: projection shortcut path (stride 2, channel change).
    in_planes, planes, stride = 4, 8, 2
    kx, kp, key = jax.random.split(key, 3)
    x = jax.random.normal(kx, (2, in_planes, 16, 16), jnp.float32)   # NCHW
    params = make_params(kp, in_planes, planes, stride)
    out = jax.block_until_ready(fwd(x, params, stride))
    ref = jax.block_until_ready(reference_forward(x, params, stride))
    assert out.shape == ref.shape == (2, planes, 8, 8)
    assert jnp.allclose(out, ref, atol=2e-2, rtol=2e-2), "mismatch (projection)"

    # Case 2: identity shortcut path (stride 1, same channels).
    in2, planes2, stride2 = 8, 8, 1
    kx2, kp2, key = jax.random.split(key, 3)
    x2 = jax.random.normal(kx2, (2, in2, 16, 16), jnp.float32)
    params2 = make_params(kp2, in2, planes2, stride2)
    out2 = jax.block_until_ready(fwd(x2, params2, stride2))
    ref2 = jax.block_until_ready(reference_forward(x2, params2, stride2))
    assert out2.shape == ref2.shape == (2, planes2, 16, 16)
    assert jnp.allclose(out2, ref2, atol=2e-2, rtol=2e-2), "mismatch (identity)"

    print("KERNEL_OK")
</pallas_src>

<mosaic_0001>
module attributes {stable_mosaic.version = 11 : i64} {
  func.func @_conv_bn_act_kernel(%arg0: i32, %arg1: i32, %arg2: i32, %arg3: memref<128x128xbf16, #tpu.memory_space<vmem>>, %arg4: memref<128x128xbf16, #tpu.memory_space<vmem>>, %arg5: memref<1x128xf32, #tpu.memory_space<vmem>>, %arg6: memref<1x128xf32, #tpu.memory_space<vmem>>, %arg7: memref<128x128xbf16, #tpu.memory_space<vmem>>, %arg8: memref<128x128xf32, #tpu.memory_space<vmem>>) attributes {dimension_semantics = [#tpu.dimension_semantics<parallel>, #tpu.dimension_semantics<parallel>, #tpu.dimension_semantics<arbitrary>], iteration_bounds = array<i64: 1, 1, 1>, scalar_prefetch = 0 : i64, scratch_operands = 1 : i64, tpu.core_type = #tpu.core_type<tc>, window_params = [{transform_indices = @transform_0, window_bounds = array<i64: 128, 128>}, {transform_indices = @transform_1, window_bounds = array<i64: 128, 128>}, {transform_indices = @transform_2, window_bounds = array<i64: 1, 128>}, {transform_indices = @transform_3, window_bounds = array<i64: 1, 128>}, {transform_indices = @transform_4, window_bounds = array<i64: 128, 128>}]} {
    %c0_i32 = arith.constant 0 : i32
    %0 = arith.cmpi eq, %arg2, %c0_i32 : i32
    %1 = arith.extui %0 : i1 to i32
    %c0_i32_0 = arith.constant 0 : i32
    %2 = arith.cmpi ne, %1, %c0_i32_0 : i32
    scf.if %2 {
      %cst_10 = arith.constant 0.000000e+00 : f32
      %12 = vector.broadcast %cst_10 : f32 to vector<128x128xf32>
      %c0_11 = arith.constant 0 : index
      %c0_12 = arith.constant 0 : index
      %13 = vector.load %arg8[%c0_11, %c0_12] : memref<128x128xf32, #tpu.memory_space<vmem>>, vector<128x128xf32>
      tpu.vector_store %arg8[%c0_11, %c0_12], %12 {strides = array<i32>} : memref<128x128xf32, #tpu.memory_space<vmem>>, vector<128x128xf32>,
    } else {
    }
    %c0 = arith.constant 0 : index
    %c0_1 = arith.constant 0 : index
    %3 = vector.load %arg8[%c0, %c0_1] : memref<128x128xf32, #tpu.memory_space<vmem>>, vector<128x128xf32>
    %c0_2 = arith.constant 0 : index
    %c0_3 = arith.constant 0 : index
    %4 = vector.load %arg3[%c0_2, %c0_3] : memref<128x128xbf16, #tpu.memory_space<vmem>>, vector<128x128xbf16>
    %c0_4 = arith.constant 0 : index
    %c0_5 = arith.constant 0 : index
    %5 = vector.load %arg4[%c0_4, %c0_5] : memref<128x128xbf16, #tpu.memory_space<vmem>>, vector<128x128xbf16>
    %cst = arith.constant dense<0.000000e+00> : vector<128x128xf32>
    %6 = tpu.matmul %4, %5, %cst {dimension_numbers = #tpu.dot_dimension_numbers<[1], [0], [0], [1], [0, 0, 1, 1], [], []>} : vector<128x128xbf16>, vector<128x128xbf16>, vector<128x128xf32> -> vector<128x128xf32>
    %7 = arith.addf %3, %6 : vector<128x128xf32>
    %c0_6 = arith.constant 0 : index
    %c0_7 = arith.constant 0 : index
    %8 = vector.load %arg8[%c0_6, %c0_7] : memref<128x128xf32, #tpu.memory_space<vmem>>, vector<128x128xf32>
    tpu.vector_store %arg8[%c0_6, %c0_7], %7 {strides = array<i32>} : memref<128x128xf32, #tpu.memory_space<vmem>>, vector<128x128xf32>,
    %c0_i32_8 = arith.constant 0 : i32
    %9 = arith.cmpi eq, %arg2, %c0_i32_8 : i32
    %10 = arith.extui %9 : i1 to i32
    %c0_i32_9 = arith.constant 0 : i32
    %11 = arith.cmpi ne, %10, %c0_i32_9 : i32
    scf.if %11 {
      %c0_10 = arith.constant 0 : index
      %c0_11 = arith.constant 0 : index
      %12 = vector.load %arg8[%c0_10, %c0_11] : memref<128x128xf32, #tpu.memory_space<vmem>>, vector<128x128xf32>
      %c0_12 = arith.constant 0 : index
      %c0_13 = arith.constant 0 : index
      %13 = vector.load %arg5[%c0_12, %c0_13] : memref<1x128xf32, #tpu.memory_space<vmem>>, vector<1x128xf32>
      %14 = vector.broadcast %13 : vector<1x128xf32> to vector<128x128xf32>
      %15 = arith.mulf %12, %14 : vector<128x128xf32>
      %c0_14 = arith.constant 0 : index
      %c0_15 = arith.constant 0 : index
      %16 = vector.load %arg6[%c0_14, %c0_15] : memref<1x128xf32, #tpu.memory_space<vmem>>, vector<1x128xf32>
      %17 = vector.broadcast %16 : vector<1x128xf32> to vector<128x128xf32>
      %18 = arith.addf %15, %17 : vector<128x128xf32>
      %cst_16 = arith.constant 0.000000e+00 : f32
      %19 = vector.broadcast %cst_16 : f32 to vector<128x128xf32>
      %20 = arith.maximumf %18, %19 : vector<128x128xf32>
      %21 = arith.truncf %20 : vector<128x128xf32> to vector<128x128xbf16>
      %c0_17 = arith.constant 0 : index
      %c0_18 = arith.constant 0 : index
      %22 = vector.load %arg7[%c0_17, %c0_18] : memref<128x128xbf16, #tpu.memory_space<vmem>>, vector<128x128xbf16>
      tpu.vector_store %arg7[%c0_17, %c0_18], %21 {strides = array<i32>} : memref<128x128xbf16, #tpu.memory_space<vmem>>, vector<128x128xbf16>,
    } else {
    }
    return
  }
  func.func @transform_0(%arg0: i32, %arg1: i32, %arg2: i32) -> (i32, i32) {
    %c0_i32 = arith.constant 0 : i32
    return %arg0, %arg2 : i32, i32
  }
  func.func @transform_1(%arg0: i32, %arg1: i32, %arg2: i32) -> (i32, i32) {
    %c0_i32 = arith.constant 0 : i32
    return %arg2, %arg1 : i32, i32
  }
  func.func @transform_2(%arg0: i32, %arg1: i32, %arg2: i32) -> (i32, i32) {
    %c0_i32 = arith.constant 0 : i32
    %c0_i32_0 = arith.constant 0 : i32
    return %c0_i32, %arg1 : i32, i32
  }
  func.func @transform_3(%arg0: i32, %arg1: i32, %arg2: i32) -> (i32, i32) {
    %c0_i32 = arith.constant 0 : i32
    %c0_i32_0 = arith.constant 0 : i32
    return %c0_i32, %arg1 : i32, i32
  }
  func.func @transform_4(%arg0: i32, %arg1: i32, %arg2: i32) -> (i32, i32) {
    %c0_i32 = arith.constant 0 : i32
    return %arg0, %arg1 : i32, i32
  }
}

module attributes {stable_mosaic.version = 11 : i64} {
  func.func @_conv_bn_proj_add_relu_kernel(%arg0: i32, %arg1: i32, %arg2: i32, %arg3: memref<128x128xbf16, #tpu.memory_space<vmem>>, %arg4: memref<128x128xbf16, #tpu.memory_space<vmem>>, %arg5: memref<1x128xf32, #tpu.memory_space<vmem>>, %arg6: memref<1x128xf32, #tpu.memory_space<vmem>>, %arg7: memref<128x128xbf16, #tpu.memory_space<vmem>>, %arg8: memref<128x128xbf16, #tpu.memory_space<vmem>>, %arg9: memref<1x128xf32, #tpu.memory_space<vmem>>, %arg10: memref<128x128xf32, #tpu.memory_space<vmem>>, %arg11: memref<128x128xf32, #tpu.memory_space<vmem>>) attributes {dimension_semantics = [#tpu.dimension_semantics<parallel>, #tpu.dimension_semantics<parallel>, #tpu.dimension_semantics<arbitrary>], iteration_bounds = array<i64: 1, 1, 1>, scalar_prefetch = 0 : i64, scratch_operands = 1 : i64, tpu.core_type = #tpu.core_type<tc>, window_params = [{transform_indices = @transform_0, window_bounds = array<i64: 128, 128>}, {transform_indices = @transform_1, window_bounds = array<i64: 128, 128>}, {transform_indices = @transform_2, window_bounds = array<i64: 1, 128>}, {transform_indices = @transform_3, window_bounds = array<i64: 1, 128>}, {transform_indices = @transform_4, window_bounds = array<i64: 128, 128>}, {transform_indices = @transform_5, window_bounds = array<i64: 128, 128>}, {transform_indices = @transform_6, window_bounds = array<i64: 1, 128>}, {transform_indices = @transform_7, window_bounds = array<i64: 128, 128>}]} {
    %c0_i32 = arith.constant 0 : i32
    %0 = arith.cmpi eq, %arg2, %c0_i32 : i32
    %1 = arith.extui %0 : i1 to i32
    %c0_i32_0 = arith.constant 0 : i32
    %2 = arith.cmpi ne, %1, %c0_i32_0 : i32
    scf.if %2 {
      %cst_10 = arith.constant 0.000000e+00 : f32
      %12 = vector.broadcast %cst_10 : f32 to vector<128x128xf32>
      %c0_11 = arith.constant 0 : index
      %c0_12 = arith.constant 0 : index
      %13 = vector.load %arg11[%c0_11, %c0_12] : memref<128x128xf32, #tpu.memory_space<vmem>>, vector<128x128xf32>
      tpu.vector_store %arg11[%c0_11, %c0_12], %12 {strides = array<i32>} : memref<128x128xf32, #tpu.memory_space<vmem>>, vector<128x128xf32>,
    } else {
    }
    %c0 = arith.constant 0 : index
    %c0_1 = arith.constant 0 : index
    %3 = vector.load %arg11[%c0, %c0_1] : memref<128x128xf32, #tpu.memory_space<vmem>>, vector<128x128xf32>
    %c0_2 = arith.constant 0 : index
    %c0_3 = arith.constant 0 : index
    %4 = vector.load %arg3[%c0_2, %c0_3] : memref<128x128xbf16, #tpu.memory_space<vmem>>, vector<128x128xbf16>
    %c0_4 = arith.constant 0 : index
    %c0_5 = arith.constant 0 : index
    %5 = vector.load %arg4[%c0_4, %c0_5] : memref<128x128xbf16, #tpu.memory_space<vmem>>, vector<128x128xbf16>
    %cst = arith.constant dense<0.000000e+00> : vector<128x128xf32>
    %6 = tpu.matmul %4, %5, %cst {dimension_numbers = #tpu.dot_dimension_numbers<[1], [0], [0], [1], [0, 0, 1, 1], [], []>} : vector<128x128xbf16>, vector<128x128xbf16>, vector<128x128xf32> -> vector<128x128xf32>
    %7 = arith.addf %3, %6 : vector<128x128xf32>
    %c0_6 = arith.constant 0 : index
    %c0_7 = arith.constant 0 : index
    %8 = vector.load %arg11[%c0_6, %c0_7] : memref<128x128xf32, #tpu.memory_space<vmem>>, vector<128x128xf32>
    tpu.vector_store %arg11[%c0_6, %c0_7], %7 {strides = array<i32>} : memref<128x128xf32, #tpu.memory_space<vmem>>, vector<128x128xf32>,
    %c0_i32_8 = arith.constant 0 : i32
    %9 = arith.cmpi eq, %arg2, %c0_i32_8 : i32
    %10 = arith.extui %9 : i1 to i32
    %c0_i32_9 = arith.constant 0 : i32
    %11 = arith.cmpi ne, %10, %c0_i32_9 : i32
    scf.if %11 {
      %c0_10 = arith.constant 0 : index
      %c0_11 = arith.constant 0 : index
      %12 = vector.load %arg7[%c0_10, %c0_11] : memref<128x128xbf16, #tpu.memory_space<vmem>>, vector<128x128xbf16>
      %c0_12 = arith.constant 0 : index
      %c0_13 = arith.constant 0 : index
      %13 = vector.load %arg8[%c0_12, %c0_13] : memref<128x128xbf16, #tpu.memory_space<vmem>>, vector<128x128xbf16>
      %cst_14 = arith.constant dense<0.000000e+00> : vector<128x128xf32>
      %14 = tpu.matmul %12, %13, %cst_14 {dimension_numbers = #tpu.dot_dimension_numbers<[1], [0], [0], [1], [0, 0, 1, 1], [], []>} : vector<128x128xbf16>, vector<128x128xbf16>, vector<128x128xf32> -> vector<128x128xf32>
      %c0_15 = arith.constant 0 : index
      %c0_16 = arith.constant 0 : index
      %15 = vector.load %arg9[%c0_15, %c0_16] : memref<1x128xf32, #tpu.memory_space<vmem>>, vector<1x128xf32>
      %16 = vector.broadcast %15 : vector<1x128xf32> to vector<128x128xf32>
      %17 = arith.addf %14, %16 : vector<128x128xf32>
      %c0_17 = arith.constant 0 : index
      %c0_18 = arith.constant 0 : index
      %18 = vector.load %arg11[%c0_17, %c0_18] : memref<128x128xf32, #tpu.memory_space<vmem>>, vector<128x128xf32>
      %c0_19 = arith.constant 0 : index
      %c0_20 = arith.constant 0 : index
      %19 = vector.load %arg5[%c0_19, %c0_20] : memref<1x128xf32, #tpu.memory_space<vmem>>, vector<1x128xf32>
      %20 = vector.broadcast %19 : vector<1x128xf32> to vector<128x128xf32>
      %21 = arith.mulf %18, %20 : vector<128x128xf32>
      %c0_21 = arith.constant 0 : index
      %c0_22 = arith.constant 0 : index
      %22 = vector.load %arg6[%c0_21, %c0_22] : memref<1x128xf32, #tpu.memory_space<vmem>>, vector<1x128xf32>
      %23 = vector.broadcast %22 : vector<1x128xf32> to vector<128x128xf32>
      %24 = arith.addf %21, %23 : vector<128x128xf32>
      %25 = arith.addf %24, %17 : vector<128x128xf32>
      %cst_23 = arith.constant 0.000000e+00 : f32
      %26 = vector.broadcast %cst_23 : f32 to vector<128x128xf32>
      %27 = arith.maximumf %25, %26 : vector<128x128xf32>
      %c0_24 = arith.constant 0 : index
      %c0_25 = arith.constant 0 : index
      %28 = vector.load %arg10[%c0_24, %c0_25] : memref<128x128xf32, #tpu.memory_space<vmem>>, vector<128x128xf32>
      tpu.vector_store %arg10[%c0_24, %c0_25], %27 {strides = array<i32>} : memref<128x128xf32, #tpu.memory_space<vmem>>, vector<128x128xf32>,
    } else {
    }
    return
  }
  func.func @transform_0(%arg0: i32, %arg1: i32, %arg2: i32) -> (i32, i32) {
    %c0_i32 = arith.constant 0 : i32
    return %arg0, %arg2 : i32, i32
  }
  func.func @transform_1(%arg0: i32, %arg1: i32, %arg2: i32) -> (i32, i32) {
    %c0_i32 = arith.constant 0 : i32
    return %arg2, %arg1 : i32, i32
  }
  func.func @transform_2(%arg0: i32, %arg1: i32, %arg2: i32) -> (i32, i32) {
    %c0_i32 = arith.constant 0 : i32
    %c0_i32_0 = arith.constant 0 : i32
    return %c0_i32, %arg1 : i32, i32
  }
  func.func @transform_3(%arg0: i32, %arg1: i32, %arg2: i32) -> (i32, i32) {
    %c0_i32 = arith.constant 0 : i32
    %c0_i32_0 = arith.constant 0 : i32
    return %c0_i32, %arg1 : i32, i32
  }
  func.func @transform_4(%arg0: i32, %arg1: i32, %arg2: i32) -> (i32, i32) {
    %c0_i32 = arith.constant 0 : i32
    %c0_i32_0 = arith.constant 0 : i32
    return %arg0, %c0_i32 : i32, i32
  }
  func.func @transform_5(%arg0: i32, %arg1: i32, %arg2: i32) -> (i32, i32) {
    %c0_i32 = arith.constant 0 : i32
    %c0_i32_0 = arith.constant 0 : i32
    return %c0_i32, %arg1 : i32, i32
  }
  func.func @transform_6(%arg0: i32, %arg1: i32, %arg2: i32) -> (i32, i32) {
    %c0_i32 = arith.constant 0 : i32
    %c0_i32_0 = arith.constant 0 : i32
    return %c0_i32, %arg1 : i32, i32
  }
  func.func @transform_7(%arg0: i32, %arg1: i32, %arg2: i32) -> (i32, i32) {
    %c0_i32 = arith.constant 0 : i32
    return %arg0, %arg1 : i32, i32
  }
}

</mosaic_0001>

<bundles_post_ra>
// kernel: basic_block_forward.2
= control target key start
LH: loop header
LB: loop body
LE: loop exit
PB: predicated region body
PF: predicated region fallthrough
CT: control target
= control target key end

     0   :  { %s774_s1 = inlined_call_operand.vmem [shape: bf16[128,128], index: 1, kind: input, shape index: {}]   ;;  %s775_s0 = inlined_call_operand.vmem [shape: bf16[128,128], index: 0, kind: input, shape index: {}]   ;;  %s776_s2 = inlined_call_operand.vmem [shape: f32[1,128], index: 2, kind: input, shape index: {}]   ;;  %s777_s3 = inlined_call_operand.vmem [shape: f32[1,128], index: 3, kind: input, shape index: {}]   ;;  %s778_s4 = inlined_call_operand.vmem [shape: bf16[128,128], index: 4, kind: output, shape index: {}]  }
   0x1   :  { %v637_v0 = vld [vmem:[%s774_s1 + $0x38] sm:$0xff]   ;;  %v638_v1 = vld [vmem:[%s774_s1 + $0x30] sm:$0xff]   ;;  %v639_v2 = vld [vmem:[%s774_s1 + $0x28] sm:$0xff]  }
   0x2   :  { %589 = vmatprep.subr.bf16.mxu0 %v637_v0  ;;  %621 = vmatprep.subr.bf16.mxu1 %v637_v0  ;;  %v640_v3 = vld [vmem:[%s774_s1 + $0x20] sm:$0xff]   ;;  %v641_v6 = vld [vmem:[%s774_s1 + $0x18] sm:$0xff]   ;;  %v642_v7 = vld [vmem:[%s774_s1 + $0x10] sm:$0xff]  }
   0x3   :  { %590 = vmatpush3.bf16.msra.mxu0 %v637_v0  ;;  %629 = vmatpush3.bf16.msra.mxu1 %v637_v0  ;;  %v645_v4 = vld [vmem:[%s775_s0] sm:$0xff]   ;;  %v643_v8 = vld [vmem:[%s774_s1 + $0x8] sm:$0xff]   ;;  %v649_v12 = vld [vmem:[%s775_s0 + $0x10] sm:$0xff]  }
   0x4   :  { %591 = vmatprep.subr.bf16.mxu0 %v638_v1  ;;  %622 = vmatprep.subr.bf16.mxu1 %v638_v1  ;;  %v646_v5 = vld [vmem:[%s775_s0 + $0x20] sm:$0xff]   ;;  %v647_v10 = vld [vmem:[%s775_s0 + $0x8] sm:$0xff]   ;;  %v650_v13 = vld [vmem:[%s775_s0 + $0x30] sm:$0xff]  }
   0x5   :  { %605 = vmatprep.mubr.bf16.mxu0 %v645_v4  ;;  %613 = vmatprep.mubr.bf16.mxu1 %v646_v5  ;;  %v644_v9 = vld [vmem:[%s774_s1] sm:$0xff]   ;;  %v648_v11 = vld [vmem:[%s775_s0 + $0x28] sm:$0xff]   ;;  %v651_v14 = vld [vmem:[%s775_s0 + $0x18] sm:$0xff]  }
   0x6   :  { %v652_v15 = vld [vmem:[%s775_s0 + $0x38] sm:$0xff]   ;;  %v729_v16 = vld [vmem:[%s776_s2] ss:$0 sm:$0xff] }
   0x7   :  { %592 = vmatpush3.bf16.msra.mxu0 %v638_v1  ;;  %630 = vmatpush3.bf16.msra.mxu1 %v638_v1  ;;  %v493_v21 = vld [vmem:[%s777_s3] ss:$0 sm:$0xff] }
   0x8   :  { %593 = vmatprep.subr.bf16.mxu0 %v639_v2  ;;  %623 = vmatprep.subr.bf16.mxu1 %v639_v2 }
   0xb   :  { %594 = vmatpush3.bf16.msra.mxu0 %v639_v2  ;;  %631 = vmatpush3.bf16.msra.mxu1 %v639_v2 }
   0xc   :  { %595 = vmatprep.subr.bf16.mxu0 %v640_v3  ;;  %624 = vmatprep.subr.bf16.mxu1 %v640_v3 }
   0xf   :  { %596 = vmatpush3.bf16.msra.mxu0 %v640_v3  ;;  %632 = vmatpush3.bf16.msra.mxu1 %v640_v3 }
  0x10   :  { %597 = vmatprep.subr.bf16.mxu0 %v641_v6  ;;  %625 = vmatprep.subr.bf16.mxu1 %v641_v6 }
  0x13   :  { %598 = vmatpush3.bf16.msra.mxu0 %v641_v6  ;;  %633 = vmatpush3.bf16.msra.mxu1 %v641_v6 }
  0x14   :  { %599 = vmatprep.subr.bf16.mxu0 %v642_v7  ;;  %626 = vmatprep.subr.bf16.mxu1 %v642_v7 }
  0x17   :  { %600 = vmatpush3.bf16.msra.mxu0 %v642_v7  ;;  %634 = vmatpush3.bf16.msra.mxu1 %v642_v7 }
  0x18   :  { %601 = vmatprep.subr.bf16.mxu0 %v643_v8  ;;  %627 = vmatprep.subr.bf16.mxu1 %v643_v8 }
  0x1b   :  { %602 = vmatpush3.bf16.msra.mxu0 %v643_v8  ;;  %635 = vmatpush3.bf16.msra.mxu1 %v643_v8 }
  0x1c   :  { %603 = vmatprep.subr.bf16.mxu0 %v644_v9  ;;  %628 = vmatprep.subr.bf16.mxu1 %v644_v9 }
  0x1f   :  { %604 = vmatpush3.bf16.msra.mxu0 %v644_v9  ;;  %636 = vmatpush3.bf16.msra.mxu1 %v644_v9 }
  0x22   :  { %606 = vmatmul.mubr.bf16.vlgmr.msra.gmra.mxu0 %v647_v10  ;;  %614 = vmatmul.mubr.bf16.vlgmr.msra.gmra.mxu1 %v648_v11 }
  0x23   :  { %609 = vmatprep.mubr.bf16.mxu0 %v649_v12  ;;  %617 = vmatprep.mubr.bf16.mxu1 %v650_v13 }
  0x2a   :  { %610 = vmatmul.mubr.bf16.gmra.mxu0 %v651_v14  ;;  %618 = vmatmul.mubr.bf16.gmra.mxu1 %v652_v15 }
  0xe2   :  { %v607_v17 = vpop.f32.mrf.mxu0  ;;  %v615_v18 = vpop.f32.mrf.mxu1 }
  0xe3   :  { %v339_v19 = vmul.f32 %v607_v17, %v729_v16  ;;  %v347_v20 = vmul.f32 %v615_v18, %v729_v16 }
  0xe4   :  { %v216_v22 = vpop.f32.mrf.mxu0  ;;  %v248_v23 = vpop.f32.mrf.mxu1 }
  0xe5   :  { %v337_v24 = vmul.f32 %v729_v16, %v216_v22  ;;  %v345_v25 = vmul.f32 %v729_v16, %v248_v23  ;;  %v362_v28 = vadd.f32 %v493_v21, %v339_v19  ;;  %v370_v29 = vadd.f32 %v493_v21, %v347_v20 }
  0xe6   :  { %v608_v26 = vpop.f32.mrf.mxu0  ;;  %v616_v27 = vpop.f32.mrf.mxu1 }
  0xe7   :  { %v340_v30 = vmul.f32 %v608_v26, %v729_v16  ;;  %v348_v31 = vmul.f32 %v616_v27, %v729_v16  ;;  %v360_v34 = vadd.f32 %v493_v21, %v337_v24  ;;  %v368_v35 = vadd.f32 %v493_v21, %v345_v25 }
  0xe8   :  { %v219_v32 = vpop.f32.mrf.mxu0  ;;  %v251_v33 = vpop.f32.mrf.mxu1  ;;  %v378_v42 = vmax.f32 %v362_v28, 0.0  ;;  %v386_v43 = vmax.f32 %v370_v29, 0.0 }
  0xe9   :  { %v338_v36 = vmul.f32 %v729_v16, %v219_v32  ;;  %v346_v37 = vmul.f32 %v729_v16, %v251_v33  ;;  %v363_v38 = vadd.f32 %v493_v21, %v340_v30  ;;  %v371_v39 = vadd.f32 %v493_v21, %v348_v31 }
  0xea   :  { %v611_v40 = vpop.f32.mrf.mxu0  ;;  %v619_v41 = vpop.f32.mrf.mxu1  ;;  %v376_v52 = vmax.f32 %v360_v34, 0.0  ;;  %v384_v53 = vmax.f32 %v368_v35, 0.0 }
  0xeb   :  { %v361_v44 = vadd.f32 %v493_v21, %v338_v36  ;;  %v369_v45 = vadd.f32 %v493_v21, %v346_v37  ;;  %v379_v46 = vmax.f32 %v363_v38, 0.0  ;;  %v387_v47 = vmax.f32 %v371_v39, 0.0 }
  0xec   :  { %v343_v48 = vmul.f32 %v611_v40, %v729_v16  ;;  %v351_v49 = vmul.f32 %v619_v41, %v729_v16  ;;  %v232_v50 = vpop.f32.mrf.mxu0  ;;  %v264_v51 = vpop.f32.mrf.mxu1 }
  0xed   :  { %v377_v54 = vmax.f32 %v361_v44, 0.0  ;;  %v385_v55 = vmax.f32 %v369_v45, 0.0  ;;  %v534_v56 = vpack.c.bf16 %v379_v46, %v378_v42  ;;  %v554_v57 = vpack.c.bf16 %v387_v47, %v386_v43 }
  0xee   :  { %v341_v58 = vmul.f32 %v729_v16, %v232_v50  ;;  %v349_v59 = vmul.f32 %v729_v16, %v264_v51  ;;  %v612_v60 = vpop.f32.mrf.mxu0  ;;  %v620_v61 = vpop.f32.mrf.mxu1  ;;  %v366_v0 = vadd.f32 %v493_v21, %v343_v48  ;;  %v374_v1 = vadd.f32 %v493_v21, %v351_v49 }
  0xef   :  { %v529_v62 = vpack.c.bf16 %v377_v54, %v376_v52  ;;  %v549_v63 = vpack.c.bf16 %v385_v55, %v384_v53  ;;  %566 = vst [vmem:[%s778_s4 + $0x8] sm:$0xff] %v534_v56   ;;  %570 = vst [vmem:[%s778_s4 + $0x28] sm:$0xff] %v554_v57   ;;  %v344_v2 = vmul.f32 %v612_v60, %v729_v16 }
  0xf0   :  { %v352_v3 = vmul.f32 %v620_v61, %v729_v16  ;;  %v235_v4 = vpop.f32.mrf.mxu0  ;;  %v267_v5 = vpop.f32.mrf.mxu1  ;;  %v364_v6 = vadd.f32 %v493_v21, %v341_v58  ;;  %v372_v7 = vadd.f32 %v493_v21, %v349_v59  ;;  %v382_v14 = vmax.f32 %v366_v0, 0.0 }
  0xf1   :  { %530 = vst [vmem:[%s778_s4] sm:$0xff] %v529_v62   ;;  %569 = vst [vmem:[%s778_s4 + $0x20] sm:$0xff] %v549_v63   ;;  %v342_v8 = vmul.f32 %v729_v16, %v235_v4  ;;  %v350_v9 = vmul.f32 %v729_v16, %v267_v5  ;;  %v367_v10 = vadd.f32 %v493_v21, %v344_v2  ;;  %v390_v15 = vmax.f32 %v374_v1, 0.0 }
  0xf2   :  { %v375_v11 = vadd.f32 %v493_v21, %v352_v3  ;;  %v380_v19 = vmax.f32 %v364_v6, 0.0  ;;  %v388_v20 = vmax.f32 %v372_v7, 0.0 }
  0xf3   :  { %v365_v12 = vadd.f32 %v493_v21, %v342_v8  ;;  %v373_v13 = vadd.f32 %v493_v21, %v350_v9  ;;  %v383_v17 = vmax.f32 %v367_v10, 0.0 }
  0xf4   :  { %v391_v18 = vmax.f32 %v375_v11, 0.0 }
  0xf5   :  { %v381_v22 = vmax.f32 %v365_v12, 0.0  ;;  %v389_v23 = vmax.f32 %v373_v13, 0.0  ;;  %v544_v24 = vpack.c.bf16 %v383_v17, %v382_v14 }
  0xf6   :  { %v564_v25 = vpack.c.bf16 %v391_v18, %v390_v15 }
  0xf7   :  { %v539_v26 = vpack.c.bf16 %v381_v22, %v380_v19  ;;  %v559_v27 = vpack.c.bf16 %v389_v23, %v388_v20  ;;  %568 = vst [vmem:[%s778_s4 + $0x18] sm:$0xff] %v544_v24  }
  0xf8   :  { %572 = vst [vmem:[%s778_s4 + $0x38] sm:$0xff] %v564_v25  }
  0xf9   :  { %567 = vst [vmem:[%s778_s4 + $0x10] sm:$0xff] %v539_v26   ;;  %571 = vst [vmem:[%s778_s4 + $0x30] sm:$0xff] %v559_v27  }

// kernel: basic_block_forward.3
= control target key start
LH: loop header
LB: loop body
LE: loop exit
PB: predicated region body
PF: predicated region fallthrough
CT: control target
= control target key end

     0   :  { %s1079_s1 = inlined_call_operand.vmem [shape: bf16[128,128], index: 1, kind: input, shape index: {}]   ;;  %s1080_s5 = inlined_call_operand.vmem [shape: bf16[128,128], index: 5, kind: input, shape index: {}]   ;;  %s1081_s0 = inlined_call_operand.vmem [shape: bf16[128,128], index: 0, kind: input, shape index: {}]   ;;  %s1082_s4 = inlined_call_operand.vmem [shape: bf16[128,128], index: 4, kind: input, shape index: {}]   ;;  %s1083_s2 = inlined_call_operand.vmem [shape: f32[1,128], index: 2, kind: input, shape index: {}]   ;;  %s1084_s6 = inlined_call_operand.vmem [shape: f32[1,128], index: 6, kind: input, shape index: {}]   ;;  %s1085_s3 = inlined_call_operand.vmem [shape: f32[1,128], index: 3, kind: input, shape index: {}]   ;;  %s1086_s7 = inlined_call_operand.vmem [shape: f32[128,128], index: 7, kind: output, shape index: {}]  }
   0x1   :  { %v800_v0 = vld [vmem:[%s1079_s1 + $0x38] sm:$0xff]   ;;  %v802_v2 = vld [vmem:[%s1079_s1 + $0x30] sm:$0xff]   ;;  %v804_v4 = vld [vmem:[%s1079_s1 + $0x28] sm:$0xff]  }
   0x2   :  { %v801_v1 = vld [vmem:[%s1080_s5 + $0x38] sm:$0xff]   ;;  %736 = vmatprep.subr.bf16.mxu0 %v800_v0  ;;  %v803_v3 = vld [vmem:[%s1080_s5 + $0x30] sm:$0xff]   ;;  %v805_v5 = vld [vmem:[%s1080_s5 + $0x28] sm:$0xff]  }
   0x3   :  { %768 = vmatprep.subr.bf16.mxu1 %v801_v1  ;;  %737 = vmatpush3.bf16.msra.mxu0 %v800_v0  ;;  %v806_v6 = vld [vmem:[%s1079_s1 + $0x20] sm:$0xff]   ;;  %v808_v8 = vld [vmem:[%s1079_s1 + $0x18] sm:$0xff]   ;;  %v810_v10 = vld [vmem:[%s1079_s1 + $0x10] sm:$0xff]  }
   0x4   :  { %769 = vmatpush3.bf16.msra.mxu1 %v801_v1  ;;  %738 = vmatprep.subr.bf16.mxu0 %v802_v2  ;;  %v807_v7 = vld [vmem:[%s1080_s5 + $0x20] sm:$0xff]   ;;  %v809_v9 = vld [vmem:[%s1080_s5 + $0x18] sm:$0xff]   ;;  %v811_v11 = vld [vmem:[%s1080_s5 + $0x10] sm:$0xff]  }
   0x5   :  { %770 = vmatprep.subr.bf16.mxu1 %v803_v3  ;;  %v816_v12 = vld [vmem:[%s1081_s0] sm:$0xff]   ;;  %v812_v14 = vld [vmem:[%s1079_s1 + $0x8] sm:$0xff]   ;;  %v820_v20 = vld [vmem:[%s1081_s0 + $0x10] sm:$0xff]  }
   0x6   :  { %v817_v13 = vld [vmem:[%s1082_s4] sm:$0xff]   ;;  %752 = vmatprep.mubr.bf16.mxu0 %v816_v12  ;;  %v813_v15 = vld [vmem:[%s1080_s5 + $0x8] sm:$0xff]   ;;  %v821_v21 = vld [vmem:[%s1082_s4 + $0x10] sm:$0xff]  }
   0x7   :  { %739 = vmatpush3.bf16.msra.mxu0 %v802_v2  ;;  %784 = vmatprep.mubr.bf16.mxu1 %v817_v13  ;;  %v814_v16 = vld [vmem:[%s1079_s1] sm:$0xff]   ;;  %v818_v18 = vld [vmem:[%s1081_s0 + $0x8] sm:$0xff]   ;;  %v822_v22 = vld [vmem:[%s1081_s0 + $0x18] sm:$0xff]  }
   0x8   :  { %771 = vmatpush3.bf16.msra.mxu1 %v803_v3  ;;  %740 = vmatprep.subr.bf16.mxu0 %v804_v4  ;;  %v815_v17 = vld [vmem:[%s1080_s5] sm:$0xff]   ;;  %v819_v19 = vld [vmem:[%s1082_s4 + $0x8] sm:$0xff]   ;;  %v823_v23 = vld [vmem:[%s1082_s4 + $0x18] sm:$0xff]  }
   0x9   :  { %772 = vmatprep.subr.bf16.mxu1 %v805_v5  ;;  %v824_v24 = vld [vmem:[%s1081_s0 + $0x20] sm:$0xff]   ;;  %v826_v26 = vld [vmem:[%s1081_s0 + $0x28] sm:$0xff]   ;;  %v828_v28 = vld [vmem:[%s1081_s0 + $0x30] sm:$0xff]  }
   0xa   :  { %v825_v25 = vld [vmem:[%s1082_s4 + $0x20] sm:$0xff]   ;;  %v827_v27 = vld [vmem:[%s1082_s4 + $0x28] sm:$0xff]   ;;  %v829_v29 = vld [vmem:[%s1082_s4 + $0x30] sm:$0xff]  }
   0xb   :  { %741 = vmatpush3.bf16.msra.mxu0 %v804_v4  ;;  %v830_v30 = vld [vmem:[%s1081_s0 + $0x38] sm:$0xff]   ;;  %v971_v32 = vld [vmem:[%s1083_s2] ss:$0 sm:$0xff] }
   0xc   :  { %773 = vmatpush3.bf16.msra.mxu1 %v805_v5  ;;  %742 = vmatprep.subr.bf16.mxu0 %v806_v6  ;;  %v831_v31 = vld [vmem:[%s1082_s4 + $0x38] sm:$0xff]   ;;  %v976_v33 = vld [vmem:[%s1084_s6] ss:$0 sm:$0xff] }
   0xd   :  { %774 = vmatprep.subr.bf16.mxu1 %v807_v7  ;;  %v981_v35 = vld [vmem:[%s1085_s3] ss:$0 sm:$0xff] }
   0xf   :  { %743 = vmatpush3.bf16.msra.mxu0 %v806_v6 }
  0x10   :  { %775 = vmatpush3.bf16.msra.mxu1 %v807_v7  ;;  %744 = vmatprep.subr.bf16.mxu0 %v808_v8 }
  0x11   :  { %776 = vmatprep.subr.bf16.mxu1 %v809_v9 }
  0x13   :  { %745 = vmatpush3.bf16.msra.mxu0 %v808_v8 }
  0x14   :  { %777 = vmatpush3.bf16.msra.mxu1 %v809_v9  ;;  %746 = vmatprep.subr.bf16.mxu0 %v810_v10 }
  0x15   :  { %778 = vmatprep.subr.bf16.mxu1 %v811_v11 }
  0x17   :  { %747 = vmatpush3.bf16.msra.mxu0 %v810_v10 }
  0x18   :  { %779 = vmatpush3.bf16.msra.mxu1 %v811_v11  ;;  %748 = vmatprep.subr.bf16.mxu0 %v812_v14 }
  0x19   :  { %780 = vmatprep.subr.bf16.mxu1 %v813_v15 }
  0x1b   :  { %749 = vmatpush3.bf16.msra.mxu0 %v812_v14 }
  0x1c   :  { %781 = vmatpush3.bf16.msra.mxu1 %v813_v15  ;;  %750 = vmatprep.subr.bf16.mxu0 %v814_v16 }
  0x1d   :  { %782 = vmatprep.subr.bf16.mxu1 %v815_v17 }
  0x1f   :  { %751 = vmatpush3.bf16.msra.mxu0 %v814_v16 }
  0x20   :  { %783 = vmatpush3.bf16.msra.mxu1 %v815_v17 }
  0x22   :  { %753 = vmatmul.mubr.bf16.vlgmr.msra.gmra.mxu0 %v818_v18 }
  0x23   :  { %785 = vmatmul.mubr.bf16.vlgmr.msra.gmra.mxu1 %v819_v19  ;;  %756 = vmatprep.mubr.bf16.mxu0 %v820_v20 }
  0x24   :  { %788 = vmatprep.mubr.bf16.mxu1 %v821_v21 }
  0x2a   :  { %757 = vmatmul.mubr.bf16.gmra.mxu0 %v822_v22 }
  0x2b   :  { %789 = vmatmul.mubr.bf16.gmra.mxu1 %v823_v23  ;;  %760 = vmatprep.mubr.bf16.mxu0 %v824_v24 }
  0x2c   :  { %792 = vmatprep.mubr.bf16.mxu1 %v825_v25 }
  0x32   :  { %761 = vmatmul.mubr.bf16.gmra.mxu0 %v826_v26 }
  0x33   :  { %793 = vmatmul.mubr.bf16.gmra.mxu1 %v827_v27  ;;  %764 = vmatprep.mubr.bf16.mxu0 %v828_v28 }
  0x34   :  { %796 = vmatprep.mubr.bf16.mxu1 %v829_v29 }
  0x3a   :  { %765 = vmatmul.mubr.bf16.gmra.mxu0 %v830_v30 }
  0x3b   :  { %797 = vmatmul.mubr.bf16.gmra.mxu1 %v831_v31 }
  0xe2   :  { %v754_v34 = vpop.f32.mrf.mxu0 }
  0xe3   :  { %v580_v36 = vmul.f32 %v754_v34, %v971_v32  ;;  %v786_v37 = vpop.f32.mrf.mxu1 }
  0xe4   :  { %v501_v38 = vadd.f32 %v786_v37, %v976_v33  ;;  %v225_v39 = vpop.f32.mrf.mxu0 }
  0xe5   :  { %v603_v40 = vadd.f32 %v981_v35, %v580_v36  ;;  %v578_v41 = vmul.f32 %v971_v32, %v225_v39  ;;  %v492_v42 = vpop.f32.mrf.mxu1 }
  0xe6   :  { %v755_v43 = vpop.f32.mrf.mxu0  ;;  %v493_v46 = vadd.f32 %v976_v33, %v492_v42 }
  0xe7   :  { %v619_v44 = vadd.f32 %v603_v40, %v501_v38  ;;  %v601_v45 = vadd.f32 %v981_v35, %v578_v41  ;;  %v581_v47 = vmul.f32 %v755_v43, %v971_v32  ;;  %v787_v48 = vpop.f32.mrf.mxu1 }
  0xe8   :  { %v504_v49 = vadd.f32 %v787_v48, %v976_v33  ;;  %v228_v50 = vpop.f32.mrf.mxu0 }
  0xe9   :  { %v635_v51 = vmax.f32 %v619_v44, 0.0  ;;  %v617_v52 = vadd.f32 %v601_v45, %v493_v46  ;;  %v604_v53 = vadd.f32 %v981_v35, %v581_v47  ;;  %v579_v54 = vmul.f32 %v971_v32, %v228_v50  ;;  %v495_v55 = vpop.f32.mrf.mxu1 }
  0xea   :  { %v496_v56 = vadd.f32 %v976_v33, %v495_v55  ;;  %v758_v57 = vpop.f32.mrf.mxu0 }
  0xeb   :  { %651 = vst [vmem:[%s1086_s7 + $0x10] sm:$0xff] %v635_v51  ;;  %v633_v58 = vmax.f32 %v617_v52, 0.0  ;;  %v620_v59 = vadd.f32 %v604_v53, %v504_v49  ;;  %v602_v60 = vadd.f32 %v981_v35, %v579_v54  ;;  %v584_v61 = vmul.f32 %v758_v57, %v971_v32  ;;  %v790_v62 = vpop.f32.mrf.mxu1 }
  0xec   :  { %v517_v63 = vadd.f32 %v790_v62, %v976_v33  ;;  %v241_v0 = vpop.f32.mrf.mxu0 }
  0xed   :  { %649 = vst [vmem:[%s1086_s7] sm:$0xff] %v633_v58  ;;  %v636_v1 = vmax.f32 %v620_v59, 0.0  ;;  %v618_v2 = vadd.f32 %v602_v60, %v496_v56  ;;  %v607_v3 = vadd.f32 %v981_v35, %v584_v61  ;;  %v582_v4 = vmul.f32 %v971_v32, %v241_v0  ;;  %v508_v5 = vpop.f32.mrf.mxu1 }
  0xee   :  { %v509_v6 = vadd.f32 %v976_v33, %v508_v5  ;;  %v759_v7 = vpop.f32.mrf.mxu0 }
  0xef   :  { %652 = vst [vmem:[%s1086_s7 + $0x18] sm:$0xff] %v636_v1  ;;  %v634_v8 = vmax.f32 %v618_v2, 0.0  ;;  %v623_v9 = vadd.f32 %v607_v3, %v517_v63  ;;  %v605_v10 = vadd.f32 %v981_v35, %v582_v4  ;;  %v585_v11 = vmul.f32 %v759_v7, %v971_v32  ;;  %v791_v12 = vpop.f32.mrf.mxu1 }
  0xf0   :  { %v520_v13 = vadd.f32 %v791_v12, %v976_v33  ;;  %v244_v14 = vpop.f32.mrf.mxu0 }
  0xf1   :  { %650 = vst [vmem:[%s1086_s7 + $0x8] sm:$0xff] %v634_v8  ;;  %v639_v15 = vmax.f32 %v623_v9, 0.0  ;;  %v621_v16 = vadd.f32 %v605_v10, %v509_v6  ;;  %v608_v17 = vadd.f32 %v981_v35, %v585_v11  ;;  %v583_v18 = vmul.f32 %v971_v32, %v244_v14  ;;  %v511_v19 = vpop.f32.mrf.mxu1 }
  0xf2   :  { %v512_v20 = vadd.f32 %v976_v33, %v511_v19  ;;  %v762_v21 = vpop.f32.mrf.mxu0 }
  0xf3   :  { %655 = vst [vmem:[%s1086_s7 + $0x30] sm:$0xff] %v639_v15  ;;  %v637_v22 = vmax.f32 %v621_v16, 0.0  ;;  %v624_v23 = vadd.f32 %v608_v17, %v520_v13  ;;  %v606_v24 = vadd.f32 %v981_v35, %v583_v18  ;;  %v588_v25 = vmul.f32 %v762_v21, %v971_v32  ;;  %v794_v26 = vpop.f32.mrf.mxu1 }
  0xf4   :  { %v533_v27 = vadd.f32 %v794_v26, %v976_v33  ;;  %v257_v28 = vpop.f32.mrf.mxu0 }
  0xf5   :  { %653 = vst [vmem:[%s1086_s7 + $0x20] sm:$0xff] %v637_v22  ;;  %v640_v29 = vmax.f32 %v624_v23, 0.0  ;;  %v622_v30 = vadd.f32 %v606_v24, %v512_v20  ;;  %v611_v31 = vadd.f32 %v981_v35, %v588_v25  ;;  %v586_v34 = vmul.f32 %v971_v32, %v257_v28  ;;  %v524_v36 = vpop.f32.mrf.mxu1 }
  0xf6   :  { %v525_v37 = vadd.f32 %v976_v33, %v524_v36  ;;  %v763_v38 = vpop.f32.mrf.mxu0 }
  0xf7   :  { %656 = vst [vmem:[%s1086_s7 + $0x38] sm:$0xff] %v640_v29  ;;  %v638_v39 = vmax.f32 %v622_v30, 0.0  ;;  %v627_v40 = vadd.f32 %v611_v31, %v533_v27  ;;  %v609_v41 = vadd.f32 %v981_v35, %v586_v34  ;;  %v589_v42 = vmul.f32 %v763_v38, %v971_v32  ;;  %v795_v43 = vpop.f32.mrf.mxu1 }
  0xf8   :  { %v536_v44 = vadd.f32 %v795_v43, %v976_v33  ;;  %v260_v45 = vpop.f32.mrf.mxu0 }
  0xf9   :  { %654 = vst [vmem:[%s1086_s7 + $0x28] sm:$0xff] %v638_v39  ;;  %v643_v46 = vmax.f32 %v627_v40, 0.0  ;;  %v625_v47 = vadd.f32 %v609_v41, %v525_v37  ;;  %v612_v48 = vadd.f32 %v981_v35, %v589_v42  ;;  %v587_v49 = vmul.f32 %v971_v32, %v260_v45  ;;  %v527_v50 = vpop.f32.mrf.mxu1 }
  0xfa   :  { %v528_v51 = vadd.f32 %v976_v33, %v527_v50  ;;  %v766_v52 = vpop.f32.mrf.mxu0 }
  0xfb   :  { %659 = vst [vmem:[%s1086_s7 + $0x50] sm:$0xff] %v643_v46  ;;  %v641_v53 = vmax.f32 %v625_v47, 0.0  ;;  %v628_v54 = vadd.f32 %v612_v48, %v536_v44  ;;  %v610_v55 = vadd.f32 %v981_v35, %v587_v49  ;;  %v592_v56 = vmul.f32 %v766_v52, %v971_v32  ;;  %v798_v57 = vpop.f32.mrf.mxu1 }
  0xfc   :  { %v549_v58 = vadd.f32 %v798_v57, %v976_v33  ;;  %v273_v59 = vpop.f32.mrf.mxu0 }
  0xfd   :  { %657 = vst [vmem:[%s1086_s7 + $0x40] sm:$0xff] %v641_v53  ;;  %v644_v60 = vmax.f32 %v628_v54, 0.0  ;;  %v626_v61 = vadd.f32 %v610_v55, %v528_v51  ;;  %v615_v62 = vadd.f32 %v981_v35, %v592_v56  ;;  %v590_v63 = vmul.f32 %v971_v32, %v273_v59  ;;  %v540_v0 = vpop.f32.mrf.mxu1 }
  0xfe   :  { %v541_v1 = vadd.f32 %v976_v33, %v540_v0  ;;  %v767_v2 = vpop.f32.mrf.mxu0 }
  0xff   :  { %660 = vst [vmem:[%s1086_s7 + $0x58] sm:$0xff] %v644_v60  ;;  %v642_v3 = vmax.f32 %v626_v61, 0.0  ;;  %v631_v4 = vadd.f32 %v615_v62, %v549_v58  ;;  %v613_v5 = vadd.f32 %v981_v35, %v590_v63  ;;  %v593_v6 = vmul.f32 %v767_v2, %v971_v32  ;;  %v799_v7 = vpop.f32.mrf.mxu1 }
 0x100   :  { %v552_v8 = vadd.f32 %v799_v7, %v976_v33  ;;  %v276_v9 = vpop.f32.mrf.mxu0 }
 0x101   :  { %658 = vst [vmem:[%s1086_s7 + $0x48] sm:$0xff] %v642_v3  ;;  %v647_v10 = vmax.f32 %v631_v4, 0.0  ;;  %v629_v11 = vadd.f32 %v613_v5, %v541_v1  ;;  %v616_v12 = vadd.f32 %v981_v35, %v593_v6  ;;  %v591_v13 = vmul.f32 %v971_v32, %v276_v9  ;;  %v543_v14 = vpop.f32.mrf.mxu1 }
 0x102   :  { %v544_v18 = vadd.f32 %v976_v33, %v543_v14 }
 0x103   :  { %663 = vst [vmem:[%s1086_s7 + $0x70] sm:$0xff] %v647_v10  ;;  %v645_v15 = vmax.f32 %v629_v11, 0.0  ;;  %v632_v16 = vadd.f32 %v616_v12, %v552_v8  ;;  %v614_v17 = vadd.f32 %v981_v35, %v591_v13 }
 0x105   :  { %661 = vst [vmem:[%s1086_s7 + $0x60] sm:$0xff] %v645_v15  ;;  %v648_v19 = vmax.f32 %v632_v16, 0.0  ;;  %v630_v20 = vadd.f32 %v614_v17, %v544_v18 }
 0x107   :  { %664 = vst [vmem:[%s1086_s7 + $0x78] sm:$0xff] %v648_v19  ;;  %v646_v32 = vmax.f32 %v630_v20, 0.0 }
 0x109   :  { %662 = vst [vmem:[%s1086_s7 + $0x68] sm:$0xff] %v646_v32 }

</bundles_post_ra>
